<compile_context>
chip_gen: v7x
topology: tpu7x:2x2x1
jax: 0.10.0
libtpu: 0.0.40
codegen_flags: <defaults>
</compile_context>

<pallas_src>
import functools

import jax
import jax.numpy as jnp
from jax import lax
from jax.experimental import pallas as pl
from jax.experimental.pallas import tpu as pltpu


def _angle_resnet_stack_kernel(a_ref, w1_ref, b1_ref, w2_ref, b2_ref, o_ref, *,
                               num_blocks):
    # a_ref: (TM, Cp) activation tile (input dtype)
    # w*_ref: (N, Cp, Cp) resident weights (input dtype, pre-transposed (in,out))
    # b*_ref: (N, 1, Cp) biases (f32)
    w_dtype = w1_ref.dtype
    acc = a_ref[...].astype(jnp.float32)                  # running activation, f32
    for n in range(num_blocks):                           # small static unroll
        x = jnp.maximum(acc, 0.0).astype(w_dtype)         # relu
        x = jnp.dot(x, w1_ref[n],
                    preferred_element_type=jnp.float32) + b1_ref[n]   # linear_1
        x = jnp.maximum(x, 0.0).astype(w_dtype)           # relu
        x = jnp.dot(x, w2_ref[n],
                    preferred_element_type=jnp.float32) + b2_ref[n]   # linear_2
        acc = acc + x                                     # residual
    o_ref[...] = acc.astype(o_ref.dtype)


def _round_up(x, m):
    return ((x + m - 1) // m) * m


def angle_resnet_stack(a, w1, b1, w2, b2, *, tile_rows=2048):
    """Apply N fused AngleResnetBlocks.

    a:       (..., C) activations.
    w1, w2:  (N, C, C) PyTorch nn.Linear layout (out, in).
    b1, b2:  (N, C).
    """
    c = a.shape[-1]
    num_blocks = w1.shape[0]
    lead_shape = a.shape[:-1]
    rows = 1
    for d in lead_shape:
        rows *= d
    a2d = a.reshape(rows, c)

    # --- Lane packing for narrow channel dims -----------------------------
    # Pack `pack` consecutive rows into one 128-lane row; weights become a
    # block-diagonal replication so each packed segment sees the original W.
    if c < 128 and 128 % c == 0:
        pack = 128 // c
    else:
        pack = 1
    pad_rows = (-rows) % pack
    if pad_rows:                         # at most pack-1 rows, only if needed
        a2d = jnp.pad(a2d, ((0, pad_rows), (0, 0)))
    rows_pk = a2d.shape[0] // pack
    cp = c * pack
    a2d = a2d.reshape(rows_pk, cp)       # contiguous reshape, no data movement

    # --- Parameter preparation (done once, outside the grid) --------------
    w_dtype = a.dtype
    eye = jnp.eye(pack, dtype=w_dtype)

    def block_diag(w):                   # (N, out, in) -> (N, cp, cp), (in,out)
        wt = jnp.swapaxes(w, -1, -2).astype(w_dtype)
        bd = jnp.einsum("pq,nij->npiqj", eye, wt)
        return bd.reshape(num_blocks, cp, cp)

    w1_bd = block_diag(w1)
    w2_bd = block_diag(w2)
    b1_p = jnp.tile(b1.astype(jnp.float32), (1, pack)).reshape(num_blocks, 1, cp)
    b2_p = jnp.tile(b2.astype(jnp.float32), (1, pack)).reshape(num_blocks, 1, cp)

    # --- Row tiling ---------------------------------------------------------
    # Big tiles to amortize per-step overhead; capped at tile_rows (default
    # 2048 rows * 128 lanes * 4B, double-buffered in+out ~= 4 MiB -> fits the
    # v5e 16 MiB scoped-VMEM default and the v7x 32 MiB default with headroom).
    if rows_pk <= 8:
        tm = rows_pk                      # whole array is one (full-dim) block
    else:
        tm = min(_round_up(tile_rows, 8), _round_up(pl.cdiv(rows_pk, 2), 8))
    grid = (pl.cdiv(rows_pk, tm),)        # no host-side row padding

    kernel = functools.partial(_angle_resnet_stack_kernel, num_blocks=num_blocks)
    out = pl.pallas_call(
        kernel,
        out_shape=jax.ShapeDtypeStruct((rows_pk, cp), a.dtype),
        grid_spec=pltpu.PrefetchScalarGridSpec(
            num_scalar_prefetch=0,
            grid=grid,
            in_specs=[
                pl.BlockSpec((tm, cp), lambda i: (i, 0)),                 # activations
                pl.BlockSpec((num_blocks, cp, cp), lambda i: (0, 0, 0)),  # W1 (resident)
                pl.BlockSpec((num_blocks, 1, cp), lambda i: (0, 0, 0)),   # b1
                pl.BlockSpec((num_blocks, cp, cp), lambda i: (0, 0, 0)),  # W2 (resident)
                pl.BlockSpec((num_blocks, 1, cp), lambda i: (0, 0, 0)),   # b2
            ],
            out_specs=pl.BlockSpec((tm, cp), lambda i: (i, 0)),
        ),
        compiler_params=pltpu.CompilerParams(
            dimension_semantics=("parallel",)),
    )(a2d, w1_bd, b1_p, w2_bd, b2_p)

    out = out.reshape(rows_pk * pack, c)
    if pad_rows:
        out = out[:rows]
    return out.reshape(*lead_shape, c)


def angle_resnet_block(a, w1, b1, w2, b2, *, tile_rows=2048):
    """Single AngleResnetBlock (convenience wrapper over the fused stack)."""
    return angle_resnet_stack(a, w1[None], b1[None], w2[None], b2[None],
                              tile_rows=tile_rows)


def _reference(a, w1, b1, w2, b2):
    s = a
    for n in range(w1.shape[0]):
        x = jnp.maximum(s, 0.0)
        x = jnp.dot(x, w1[n].T, precision=lax.Precision.HIGHEST) + b1[n]
        x = jnp.maximum(x, 0.0)
        x = jnp.dot(x, w2[n].T, precision=lax.Precision.HIGHEST) + b2[n]
        s = s + x
    return s


if __name__ == "__main__":
    # Small config consistent with the module: c_resnet hidden channels,
    # no_resnet_blocks stacked AngleResnetBlocks, input (..., c_resnet).
    batch, seq, c_hidden, num_blocks = 2, 8, 32, 2

    key = jax.random.PRNGKey(0)
    k_a, k_w1, k_b1, k_w2, k_b2 = jax.random.split(key, 5)

    a = jax.random.normal(k_a, (batch, seq, c_hidden), dtype=jnp.float32)

    # Deterministic synthetic parameters (PyTorch Linear layout: (out, in)).
    # linear_1 uses 'relu' (He) scaling; linear_2 is 'final' (zero) init in the
    # real module — small nonzero values here so the hot path is exercised.
    he_scale = jnp.sqrt(2.0 / c_hidden)
    w1 = jax.random.normal(k_w1, (num_blocks, c_hidden, c_hidden), jnp.float32) * he_scale
    b1 = jax.random.normal(k_b1, (num_blocks, c_hidden), jnp.float32) * 0.01
    w2 = jax.random.normal(k_w2, (num_blocks, c_hidden, c_hidden), jnp.float32) * 0.02
    b2 = jax.random.normal(k_b2, (num_blocks, c_hidden), jnp.float32) * 0.01

    out = angle_resnet_stack(a, w1, b1, w2, b2)
    out = jax.block_until_ready(out)

    ref = _reference(a, w1, b1, w2, b2)
    assert out.shape == a.shape and out.dtype == a.dtype
    assert jnp.allclose(out, ref, atol=1e-4, rtol=1e-4), "mismatch vs reference"

    print("KERNEL_OK")
</pallas_src>

<mosaic_0001>
module attributes {stable_mosaic.version = 11 : i64} {
  func.func @_angle_resnet_stack_kernel(%arg0: i32, %arg1: memref<4x128xf32, #tpu.memory_space<vmem>>, %arg2: memref<2x128x128xf32, #tpu.memory_space<vmem>>, %arg3: memref<2x1x128xf32, #tpu.memory_space<vmem>>, %arg4: memref<2x128x128xf32, #tpu.memory_space<vmem>>, %arg5: memref<2x1x128xf32, #tpu.memory_space<vmem>>, %arg6: memref<4x128xf32, #tpu.memory_space<vmem>>) attributes {dimension_semantics = [#tpu.dimension_semantics<parallel>], iteration_bounds = array<i64: 1>, scalar_prefetch = 0 : i64, scratch_operands = 0 : i64, tpu.core_type = #tpu.core_type<tc>, window_params = [{transform_indices = @transform_0, window_bounds = array<i64: 4, 128>}, {pipeline_mode = #tpu.pipeline_mode<synchronous>, transform_indices = @transform_1, window_bounds = array<i64: 2, 128, 128>}, {pipeline_mode = #tpu.pipeline_mode<synchronous>, transform_indices = @transform_2, window_bounds = array<i64: 2, 1, 128>}, {pipeline_mode = #tpu.pipeline_mode<synchronous>, transform_indices = @transform_3, window_bounds = array<i64: 2, 128, 128>}, {pipeline_mode = #tpu.pipeline_mode<synchronous>, transform_indices = @transform_4, window_bounds = array<i64: 2, 1, 128>}, {transform_indices = @transform_5, window_bounds = array<i64: 4, 128>}]} {
    %c0 = arith.constant 0 : index
    %c0_0 = arith.constant 0 : index
    %0 = vector.load %arg1[%c0, %c0_0] : memref<4x128xf32, #tpu.memory_space<vmem>>, vector<4x128xf32>
    %cst = arith.constant 0.000000e+00 : f32
    %1 = vector.broadcast %cst : f32 to vector<4x128xf32>
    %2 = arith.maximumf %0, %1 : vector<4x128xf32>
    %c0_1 = arith.constant 0 : index
    %c0_2 = arith.constant 0 : index
    %c0_3 = arith.constant 0 : index
    %3 = vector.load %arg2[%c0_1, %c0_2, %c0_3] : memref<2x128x128xf32, #tpu.memory_space<vmem>>, vector<1x128x128xf32>
    %4 = vector.shape_cast %3 : vector<1x128x128xf32> to vector<128x128xf32>
    %cst_4 = arith.constant dense<0.000000e+00> : vector<4x128xf32>
    %5 = tpu.matmul %2, %4, %cst_4 {dimension_numbers = #tpu.dot_dimension_numbers<[1], [0], [0], [1], [0, 0, 1, 1], [], []>} : vector<4x128xf32>, vector<128x128xf32>, vector<4x128xf32> -> vector<4x128xf32>
    %c0_5 = arith.constant 0 : index
    %c0_6 = arith.constant 0 : index
    %c0_7 = arith.constant 0 : index
    %6 = vector.load %arg3[%c0_5, %c0_6, %c0_7] : memref<2x1x128xf32, #tpu.memory_space<vmem>>, vector<1x1x128xf32>
    %7 = vector.shape_cast %6 : vector<1x1x128xf32> to vector<1x128xf32>
    %8 = vector.broadcast %7 : vector<1x128xf32> to vector<4x128xf32>
    %9 = arith.addf %5, %8 : vector<4x128xf32>
    %cst_8 = arith.constant 0.000000e+00 : f32
    %10 = vector.broadcast %cst_8 : f32 to vector<4x128xf32>
    %11 = arith.maximumf %9, %10 : vector<4x128xf32>
    %c0_9 = arith.constant 0 : index
    %c0_10 = arith.constant 0 : index
    %c0_11 = arith.constant 0 : index
    %12 = vector.load %arg4[%c0_9, %c0_10, %c0_11] : memref<2x128x128xf32, #tpu.memory_space<vmem>>, vector<1x128x128xf32>
    %13 = vector.shape_cast %12 : vector<1x128x128xf32> to vector<128x128xf32>
    %cst_12 = arith.constant dense<0.000000e+00> : vector<4x128xf32>
    %14 = tpu.matmul %11, %13, %cst_12 {dimension_numbers = #tpu.dot_dimension_numbers<[1], [0], [0], [1], [0, 0, 1, 1], [], []>} : vector<4x128xf32>, vector<128x128xf32>, vector<4x128xf32> -> vector<4x128xf32>
    %c0_13 = arith.constant 0 : index
    %c0_14 = arith.constant 0 : index
    %c0_15 = arith.constant 0 : index
    %15 = vector.load %arg5[%c0_13, %c0_14, %c0_15] : memref<2x1x128xf32, #tpu.memory_space<vmem>>, vector<1x1x128xf32>
    %16 = vector.shape_cast %15 : vector<1x1x128xf32> to vector<1x128xf32>
    %17 = vector.broadcast %16 : vector<1x128xf32> to vector<4x128xf32>
    %18 = arith.addf %14, %17 : vector<4x128xf32>
    %19 = arith.addf %0, %18 : vector<4x128xf32>
    %cst_16 = arith.constant 0.000000e+00 : f32
    %20 = vector.broadcast %cst_16 : f32 to vector<4x128xf32>
    %21 = arith.maximumf %19, %20 : vector<4x128xf32>
    %c1 = arith.constant 1 : index
    %c0_17 = arith.constant 0 : index
    %c0_18 = arith.constant 0 : index
    %22 = vector.load %arg2[%c1, %c0_17, %c0_18] : memref<2x128x128xf32, #tpu.memory_space<vmem>>, vector<1x128x128xf32>
    %23 = vector.shape_cast %22 : vector<1x128x128xf32> to vector<128x128xf32>
    %cst_19 = arith.constant dense<0.000000e+00> : vector<4x128xf32>
    %24 = tpu.matmul %21, %23, %cst_19 {dimension_numbers = #tpu.dot_dimension_numbers<[1], [0], [0], [1], [0, 0, 1, 1], [], []>} : vector<4x128xf32>, vector<128x128xf32>, vector<4x128xf32> -> vector<4x128xf32>
    %c1_20 = arith.constant 1 : index
    %c0_21 = arith.constant 0 : index
    %c0_22 = arith.constant 0 : index
    %25 = vector.load %arg3[%c1_20, %c0_21, %c0_22] : memref<2x1x128xf32, #tpu.memory_space<vmem>>, vector<1x1x128xf32>
    %26 = vector.shape_cast %25 : vector<1x1x128xf32> to vector<1x128xf32>
    %27 = vector.broadcast %26 : vector<1x128xf32> to vector<4x128xf32>
    %28 = arith.addf %24, %27 : vector<4x128xf32>
    %cst_23 = arith.constant 0.000000e+00 : f32
    %29 = vector.broadcast %cst_23 : f32 to vector<4x128xf32>
    %30 = arith.maximumf %28, %29 : vector<4x128xf32>
    %c1_24 = arith.constant 1 : index
    %c0_25 = arith.constant 0 : index
    %c0_26 = arith.constant 0 : index
    %31 = vector.load %arg4[%c1_24, %c0_25, %c0_26] : memref<2x128x128xf32, #tpu.memory_space<vmem>>, vector<1x128x128xf32>
    %32 = vector.shape_cast %31 : vector<1x128x128xf32> to vector<128x128xf32>
    %cst_27 = arith.constant dense<0.000000e+00> : vector<4x128xf32>
    %33 = tpu.matmul %30, %32, %cst_27 {dimension_numbers = #tpu.dot_dimension_numbers<[1], [0], [0], [1], [0, 0, 1, 1], [], []>} : vector<4x128xf32>, vector<128x128xf32>, vector<4x128xf32> -> vector<4x128xf32>
    %c1_28 = arith.constant 1 : index
    %c0_29 = arith.constant 0 : index
    %c0_30 = arith.constant 0 : index
    %34 = vector.load %arg5[%c1_28, %c0_29, %c0_30] : memref<2x1x128xf32, #tpu.memory_space<vmem>>, vector<1x1x128xf32>
    %35 = vector.shape_cast %34 : vector<1x1x128xf32> to vector<1x128xf32>
    %36 = vector.broadcast %35 : vector<1x128xf32> to vector<4x128xf32>
    %37 = arith.addf %33, %36 : vector<4x128xf32>
    %38 = arith.addf %19, %37 : vector<4x128xf32>
    %c0_31 = arith.constant 0 : index
    %c0_32 = arith.constant 0 : index
    %39 = vector.load %arg6[%c0_31, %c0_32] : memref<4x128xf32, #tpu.memory_space<vmem>>, vector<4x128xf32>
    tpu.vector_store %arg6[%c0_31, %c0_32], %38 {strides = array<i32>} : memref<4x128xf32, #tpu.memory_space<vmem>>, vector<4x128xf32>,
    return
  }
  func.func @transform_0(%arg0: i32) -> (i32, i32) {
    %c0_i32 = arith.constant 0 : i32
    %c0_i32_0 = arith.constant 0 : i32
    return %arg0, %c0_i32 : i32, i32
  }
  func.func @transform_1(%arg0: i32) -> (i32, i32, i32) {
    %c0_i32 = arith.constant 0 : i32
    %c0_i32_0 = arith.constant 0 : i32
    %c0_i32_1 = arith.constant 0 : i32
    %c0_i32_2 = arith.constant 0 : i32
    return %c0_i32, %c0_i32_0, %c0_i32_1 : i32, i32, i32
  }
  func.func @transform_2(%arg0: i32) -> (i32, i32, i32) {
    %c0_i32 = arith.constant 0 : i32
    %c0_i32_0 = arith.constant 0 : i32
    %c0_i32_1 = arith.constant 0 : i32
    %c0_i32_2 = arith.constant 0 : i32
    return %c0_i32, %c0_i32_0, %c0_i32_1 : i32, i32, i32
  }
  func.func @transform_3(%arg0: i32) -> (i32, i32, i32) {
    %c0_i32 = arith.constant 0 : i32
    %c0_i32_0 = arith.constant 0 : i32
    %c0_i32_1 = arith.constant 0 : i32
    %c0_i32_2 = arith.constant 0 : i32
    return %c0_i32, %c0_i32_0, %c0_i32_1 : i32, i32, i32
  }
  func.func @transform_4(%arg0: i32) -> (i32, i32, i32) {
    %c0_i32 = arith.constant 0 : i32
    %c0_i32_0 = arith.constant 0 : i32
    %c0_i32_1 = arith.constant 0 : i32
    %c0_i32_2 = arith.constant 0 : i32
    return %c0_i32, %c0_i32_0, %c0_i32_1 : i32, i32, i32
  }
  func.func @transform_5(%arg0: i32) -> (i32, i32) {
    %c0_i32 = arith.constant 0 : i32
    %c0_i32_0 = arith.constant 0 : i32
    return %arg0, %c0_i32 : i32, i32
  }
}

</mosaic_0001>

<bundles_post_ra>
// kernel: tpu_custom_call.1
= control target key start
LH: loop header
LB: loop body
LE: loop exit
PB: predicated region body
PF: predicated region fallthrough
CT: control target
= control target key end

     0   :  { %10 = vsyncpa [#allocation3], 0  ;;  %s1022_s0 = inlined_call_operand.hbm [shape: f32[4,128], index: 0, kind: input, shape index: {}]   ;;  %s1023_s1 = inlined_call_operand.hbm [shape: f32[2,128,128], index: 1, kind: input, shape index: {}]   ;;  %s1024_s2 = inlined_call_operand.vmem [shape: f32[2,1,128], index: 2, kind: input, shape index: {}]   ;;  %s1025_s3 = inlined_call_operand.hbm [shape: f32[2,128,128], index: 3, kind: input, shape index: {}]   ;;  %s1026_s4 = inlined_call_operand.vmem [shape: f32[2,1,128], index: 4, kind: input, shape index: {}]   ;;  %s1027_s5 = inlined_call_operand.hbm [shape: f32[4,128], index: 5, kind: output, shape index: {}]  }
   0x1   :  { %11 = vsyncpa [#allocation6], 0 }
   0x2   :  { %12 = vsyncpa [#allocation4], 0  ;;  %s873_s18 = smov [#allocation5]   ;;  %s779_s22 = scalar_lea.hbm %s1023_s1, 4096 }
   0x3   :  { %s28_s19 = sshll.u32 %s873_s18, 4  ;;  %p780_p0 = scmp.ne.s32.totalorder %s1023_s1, %s779_s22  ;;  %s29_s19 = int_to_ptr.vmem [resolvable:$true] %s28_s19 }
   0x4   :  { %p783_p1 = scmp.lt.u32.totalorder %s779_s22, %s1023_s1 }
   0x6   :  { %p785_p2 = pnand %p783_p1, %p780_p0 }
   0x8   :  { %788 = shalt.err (!%p785_p2)
}
   0x9   :  { %s789_s27 = scalar_lea.vmem %s29_s19, 4096  ;;  %p794_p4 = scmp.lt.s32.totalorder %s29_s19, %s29_s19 }
   0xa   :  { %p790_p3 = scmp.ne.s32.totalorder %s29_s19, %s789_s27  ;;  %p795_p5 = scmp.lt.s32.totalorder %s789_s27, %s789_s27 }
   0xc   :  { %p796_p6 = por %p795_p5, %p794_p4 }
   0xe   :  { %p797_p7 = pnand %p796_p6, %p790_p3 }
  0x10   :  { %800 = shalt.err (!%p797_p7)
}
  0x11   :  { %s874_s28 = smov 128   ;;  %s875_s29 = smov 8  }
  0x12   :  { %34 = dma.hbm_to_vmem [thread:$0]  %s1023_s1, 4096, %s29_s19, [#allocation6], %s874_s28, %s874_s28, %s875_s29  }
  0x13   :  { %s876_s7 = smov [#allocation2]   ;;  %s877_s9 = smov [#allocation7]  }
  0x14   :  { %s19_s8 = sshll.u32 %s876_s7, 4  ;;  %s42_s10 = sshll.u32 %s877_s9, 4  ;;  %s20_s8 = int_to_ptr.vmem [resolvable:$true] %s19_s8  ;;  %s43_s10 = int_to_ptr.vmem [resolvable:$true] %s42_s10 }
  0x15   :  { %s801_s13 = scalar_lea.hbm %s1022_s0, 64 }
  0x16   :  { %p802_p8 = scmp.ne.s32.totalorder %s1022_s0, %s801_s13  ;;  %p805_p9 = scmp.lt.u32.totalorder %s801_s13, %s1022_s0 }
  0x18   :  { %p807_p10 = pnand %p805_p9, %p802_p8 }
  0x1a   :  { %810 = shalt.err (!%p807_p10)
}
  0x1b   :  { %s811_s1 = scalar_lea.vmem %s20_s8, 64  ;;  %p816_p12 = scmp.lt.s32.totalorder %s20_s8, %s20_s8 }
  0x1c   :  { %p812_p11 = scmp.ne.s32.totalorder %s20_s8, %s811_s1  ;;  %p817_p13 = scmp.lt.s32.totalorder %s811_s1, %s811_s1 }
  0x1e   :  { %p818_p0 = por %p817_p13, %p816_p12 }
  0x20   :  { %p819_p1 = pnand %p818_p0, %p812_p11 }
  0x22   :  { %822 = shalt.err (!%p819_p1)
}
  0x23   :  { %22 = dma.hbm_to_vmem [thread:$0]  %s1022_s0, 64, %s20_s8, [#allocation3]  }
  0x24   :  { %s823_s22 = scalar_lea.hbm %s1025_s3, 4096 }
  0x25   :  { %p824_p2 = scmp.ne.s32.totalorder %s1025_s3, %s823_s22  ;;  %p827_p3 = scmp.lt.u32.totalorder %s823_s22, %s1025_s3 }
  0x27   :  { %p829_p4 = pnand %p827_p3, %p824_p2 }
  0x29   :  { %832 = shalt.err (!%p829_p4)
}
  0x2a   :  { %s833_s27 = scalar_lea.vmem %s43_s10, 4096  ;;  %p838_p6 = scmp.lt.s32.totalorder %s43_s10, %s43_s10 }
  0x2b   :  { %p834_p5 = scmp.ne.s32.totalorder %s43_s10, %s833_s27  ;;  %p839_p7 = scmp.lt.s32.totalorder %s833_s27, %s833_s27 }
  0x2d   :  { %p840_p8 = por %p839_p7, %p838_p6 }
  0x2f   :  { %p841_p9 = pnand %p840_p8, %p834_p5 }
  0x31   :  { %844 = shalt.err (!%p841_p9)
}
  0x32   :  { %48 = dma.hbm_to_vmem [thread:$0]  %s1025_s3, 4096, %s43_s10, [#allocation6], %s874_s28, %s874_s28, %s875_s29  }
  0x33   :  { %867 = dma.done.wait [#allocation3], 64  }
  0x34   :  { %868 = vsyncadd [#allocation3], 4294967232 }
  0x35   :  { %869 = dma.done.wait [#allocation6], 8192  }
  0x36   :  { %870 = vsyncadd [#allocation6], 4294959104  ;;  %v878_v0 = vmov 0.0|0.0   ;;  %vm879_vm0 = vmmov 0   ;;  %v880_v1 = vmov 0.0   ;;  %v62_v2 = vld [vmem:[#allocation5] sm:$0xff] }
  0x37   :  { %674 = vmatprep.subr.bf16.mxu0 %v878_v0  ;;  %566 = vmatprep.mubr.msk.f32.mxu0 %vm879_vm0, %v880_v1  ;;  %v63_v3 = vld [vmem:[#allocation5 + $0x8] sm:$0xff]  ;;  %v64_v4 = vld [vmem:[#allocation5 + $0x10] sm:$0xff]  ;;  %v65_v6 = vld [vmem:[#allocation5 + $0x18] sm:$0xff]  ;;  %s881_s11 = smov [#allocation8]  }
  0x38   :  { %698 = vmatprep.subr.bf16.mxu1 %v878_v0  ;;  %601 = vmatprep.mubr.msk.f32.mxu1 %vm879_vm0, %v880_v1  ;;  %v675_v5 = vpack.c.bf16 %v63_v3, %v62_v2  ;;  %v678_v7 = vpack.c.bf16 %v65_v6, %v64_v4  ;;  %v66_v8 = vld [vmem:[#allocation5 + $0x20] sm:$0xff]  ;;  %v67_v9 = vld [vmem:[#allocation5 + $0x28] sm:$0xff]  ;;  %v158_v12 = vld [vmem:[#allocation7 + $0x10] sm:$0xff]  ;;  %s450_s12 = sshll.u32 %s881_s11, 4  ;;  %s451_s12 = int_to_ptr.vmem [resolvable:$true] %s450_s12 }
  0x39   :  { %v156_v10 = vld [vmem:[#allocation7] sm:$0xff]  ;;  %v157_v11 = vld [vmem:[#allocation7 + $0x8] sm:$0xff]  ;;  %v159_v13 = vld [vmem:[#allocation7 + $0x18] sm:$0xff]  ;;  %v681_v14 = vpack.c.bf16 %v67_v9, %v66_v8  ;;  %s845_s13 = scalar_lea.vmem %s451_s12, 64  ;;  %p850_p11 = scmp.lt.s32.totalorder %s451_s12, %s451_s12 }
  0x3a   :  { %676 = vmatpush3.bf16.msra.mxu0 %v675_v5  ;;  %v699_v15 = vpack.c.bf16 %v157_v11, %v156_v10  ;;  %v68_v16 = vld [vmem:[#allocation5 + $0x30] sm:$0xff]  ;;  %v69_v17 = vld [vmem:[#allocation5 + $0x38] sm:$0xff]  ;;  %v702_v18 = vpack.c.bf16 %v159_v13, %v158_v12  ;;  %v160_v19 = vld [vmem:[#allocation7 + $0x20] sm:$0xff]  ;;  %p846_p10 = scmp.ne.s32.totalorder %s451_s12, %s845_s13  ;;  %p851_p12 = scmp.lt.s32.totalorder %s845_s13, %s845_s13 }
  0x3b   :  { %677 = vmatprep.subr.bf16.mxu0 %v878_v0  ;;  %v161_v20 = vld [vmem:[#allocation7 + $0x28] sm:$0xff]  ;;  %v684_v21 = vpack.c.bf16 %v69_v17, %v68_v16  ;;  %v70_v22 = vld [vmem:[#allocation5 + $0x40] sm:$0xff]  ;;  %v162_v25 = vld [vmem:[#allocation7 + $0x30] sm:$0xff] }
  0x3c   :  { %700 = vmatpush3.bf16.msra.mxu1 %v699_v15  ;;  %v71_v23 = vld [vmem:[#allocation5 + $0x48] sm:$0xff]  ;;  %v705_v24 = vpack.c.bf16 %v161_v20, %v160_v19  ;;  %v163_v26 = vld [vmem:[#allocation7 + $0x38] sm:$0xff]  ;;  %v72_v28 = vld [vmem:[#allocation5 + $0x50] sm:$0xff]  ;;  %p852_p13 = por %p851_p12, %p850_p11 }
  0x3d   :  { %701 = vmatprep.subr.bf16.mxu1 %v878_v0  ;;  %v687_v27 = vpack.c.bf16 %v71_v23, %v70_v22  ;;  %v73_v29 = vld [vmem:[#allocation5 + $0x58] sm:$0xff]  ;;  %v708_v30 = vpack.c.bf16 %v163_v26, %v162_v25  ;;  %v164_v31 = vld [vmem:[#allocation7 + $0x40] sm:$0xff]  ;;  %v165_v32 = vld [vmem:[#allocation7 + $0x48] sm:$0xff] }
  0x3e   :  { %679 = vmatpush3.bf16.msra.mxu0 %v678_v7  ;;  %v690_v33 = vpack.c.bf16 %v73_v29, %v72_v28  ;;  %v74_v34 = vld [vmem:[#allocation5 + $0x60] sm:$0xff]  ;;  %v75_v35 = vld [vmem:[#allocation5 + $0x68] sm:$0xff]  ;;  %v711_v36 = vpack.c.bf16 %v165_v32, %v164_v31  ;;  %v166_v37 = vld [vmem:[#allocation7 + $0x50] sm:$0xff]  ;;  %p853_p0 = pnand %p852_p13, %p846_p10 }
  0x3f   :  { %680 = vmatprep.subr.bf16.mxu0 %v878_v0  ;;  %v167_v38 = vld [vmem:[#allocation7 + $0x58] sm:$0xff]  ;;  %v693_v39 = vpack.c.bf16 %v75_v35, %v74_v34  ;;  %v76_v40 = vld [vmem:[#allocation5 + $0x70] sm:$0xff]  ;;  %v168_v43 = vld [vmem:[#allocation7 + $0x60] sm:$0xff] }
  0x40   :  { %703 = vmatpush3.bf16.msra.mxu1 %v702_v18  ;;  %v77_v41 = vld [vmem:[#allocation5 + $0x78] sm:$0xff]  ;;  %v714_v42 = vpack.c.bf16 %v167_v38, %v166_v37  ;;  %v169_v44 = vld [vmem:[#allocation7 + $0x68] sm:$0xff]  ;;  %v170_v49 = vld [vmem:[#allocation7 + $0x70] sm:$0xff] }
  0x41   :  { %704 = vmatprep.subr.bf16.mxu1 %v878_v0  ;;  %v696_v45 = vpack.c.bf16 %v77_v41, %v76_v40  ;;  %v971_v46 = vld [vmem:[#allocation2] sm:$0xf]  ;;  %v717_v47 = vpack.c.bf16 %v169_v44, %v168_v43  ;;  %v252_v52 = vld [vmem:[#allocation5 + $0x80] sm:$0xff]  ;;  %v253_v53 = vld [vmem:[#allocation5 + $0x88] sm:$0xff] }
  0x42   :  { %682 = vmatpush3.bf16.msra.mxu0 %v681_v14  ;;  %v61_v48 = vmax.f32 %v971_v46, 0.0  ;;  %v171_v50 = vld [vmem:[#allocation7 + $0x78] sm:$0xff]  ;;  %v254_v54 = vld [vmem:[#allocation5 + $0x90] sm:$0xff]  ;;  %v723_v55 = vpack.c.bf16 %v253_v53, %v252_v52  ;;  %v256_v58 = vld [vmem:[#allocation5 + $0xa0] sm:$0xff] }
  0x43   :  { %683 = vmatprep.subr.bf16.mxu0 %v878_v0  ;;  %v720_v51 = vpack.c.bf16 %v171_v50, %v170_v49  ;;  %v255_v56 = vld [vmem:[#allocation5 + $0x98] sm:$0xff]  ;;  %v257_v59 = vld [vmem:[#allocation5 + $0xa8] sm:$0xff]  ;;  %v258_v61 = vld [vmem:[#allocation5 + $0xb0] sm:$0xff] }
  0x44   :  { %706 = vmatpush3.bf16.msra.mxu1 %v705_v24  ;;  %v726_v57 = vpack.c.bf16 %v255_v56, %v254_v54  ;;  %v729_v60 = vpack.c.bf16 %v257_v59, %v256_v58  ;;  %v259_v62 = vld [vmem:[#allocation5 + $0xb8] sm:$0xff]  ;;  %v260_v2 = vld [vmem:[#allocation5 + $0xc0] sm:$0xff]  ;;  %v261_v3 = vld [vmem:[#allocation5 + $0xc8] sm:$0xff] }
  0x45   :  { %707 = vmatprep.subr.bf16.mxu1 %v878_v0  ;;  %v732_v63 = vpack.c.bf16 %v259_v62, %v258_v61  ;;  %v735_v4 = vpack.c.bf16 %v261_v3, %v260_v2  ;;  %v262_v5 = vld [vmem:[#allocation5 + $0xd0] sm:$0xff]  ;;  %v263_v6 = vld [vmem:[#allocation5 + $0xd8] sm:$0xff]  ;;  %v264_v13 = vld [vmem:[#allocation5 + $0xe0] sm:$0xff] }
  0x46   :  { %685 = vmatpush3.bf16.msra.mxu0 %v684_v21  ;;  %v738_v7 = vpack.c.bf16 %v263_v6, %v262_v5  ;;  %v460_v8 = vld [vmem:[%s1024_s2] ss:$0 sm:$0xff]  ;;  %v265_v14 = vld [vmem:[#allocation5 + $0xe8] sm:$0xff]  ;;  %v266_v16 = vld [vmem:[#allocation5 + $0xf0] sm:$0xff] }
  0x47   :  { %686 = vmatprep.subr.bf16.mxu0 %v878_v0  ;;  %v741_v15 = vpack.c.bf16 %v265_v14, %v264_v13  ;;  %v267_v17 = vld [vmem:[#allocation5 + $0xf8] sm:$0xff]  ;;  %v348_v19 = vld [vmem:[#allocation7 + $0x80] sm:$0xff]  ;;  %v349_v20 = vld [vmem:[#allocation7 + $0x88] sm:$0xff] }
  0x48   :  { %709 = vmatpush3.bf16.msra.mxu1 %v708_v30  ;;  %v744_v18 = vpack.c.bf16 %v267_v17, %v266_v16  ;;  %v350_v21 = vld [vmem:[#allocation7 + $0x90] sm:$0xff]  ;;  %v747_v22 = vpack.c.bf16 %v349_v20, %v348_v19  ;;  %v351_v23 = vld [vmem:[#allocation7 + $0x98] sm:$0xff]  ;;  %v353_v25 = vld [vmem:[#allocation7 + $0xa8] sm:$0xff] }
  0x49   :  { %710 = vmatprep.subr.bf16.mxu1 %v878_v0  ;;  %v750_v24 = vpack.c.bf16 %v351_v23, %v350_v21  ;;  %v355_v28 = vld [vmem:[#allocation7 + $0xb8] sm:$0xff]  ;;  %v356_v30 = vld [vmem:[#allocation7 + $0xc0] sm:$0xff]  ;;  %v357_v31 = vld [vmem:[#allocation7 + $0xc8] sm:$0xff] }
  0x4a   :  { %688 = vmatpush3.bf16.msra.mxu0 %v687_v27  ;;  %v354_v27 = vld [vmem:[#allocation7 + $0xb0] sm:$0xff]  ;;  %v759_v32 = vpack.c.bf16 %v357_v31, %v356_v30  ;;  %v359_v34 = vld [vmem:[#allocation7 + $0xd8] sm:$0xff]  ;;  %v361_v37 = vld [vmem:[#allocation7 + $0xe8] sm:$0xff] }
  0x4b   :  { %689 = vmatprep.subr.bf16.mxu0 %v878_v0  ;;  %v756_v29 = vpack.c.bf16 %v355_v28, %v354_v27  ;;  %v463_v49 = vld [vmem:[%s1024_s2 + $0x1] ss:$0 sm:$0xff] }
  0x4c   :  { %712 = vmatpush3.bf16.msra.mxu1 %v711_v36  ;;  %v360_v36 = vld [vmem:[#allocation7 + $0xe0] sm:$0xff]  ;;  %v465_v53 = vld [vmem:[%s1026_s4 + $0x1] ss:$0 sm:$0xff] }
  0x4d   :  { %713 = vmatprep.subr.bf16.mxu1 %v878_v0  ;;  %v765_v38 = vpack.c.bf16 %v361_v37, %v360_v36 }
  0x4e   :  { %691 = vmatpush3.bf16.msra.mxu0 %v690_v33  ;;  %v358_v33 = vld [vmem:[#allocation7 + $0xd0] sm:$0xff] }
  0x4f   :  { %692 = vmatprep.subr.bf16.mxu0 %v878_v0  ;;  %v762_v35 = vpack.c.bf16 %v359_v34, %v358_v33 }
  0x50   :  { %715 = vmatpush3.bf16.msra.mxu1 %v714_v42 }
  0x51   :  { %716 = vmatprep.subr.bf16.mxu1 %v878_v0 }
  0x52   :  { %694 = vmatpush3.bf16.msra.mxu0 %v693_v39  ;;  %v461_v39 = vld [vmem:[%s1026_s4] ss:$0 sm:$0xff] }
  0x53   :  { %695 = vmatprep.subr.bf16.mxu0 %v878_v0 }
  0x54   :  { %718 = vmatpush3.bf16.msra.mxu1 %v717_v47  ;;  %v363_v47 = vld [vmem:[#allocation7 + $0xf8] sm:$0xff] }
  0x55   :  { %719 = vmatprep.subr.bf16.mxu1 %v878_v0 }
  0x56   :  { %697 = vmatpush3.bf16.msra.mxu0 %v696_v45  ;;  %v362_v45 = vld [vmem:[#allocation7 + $0xf0] sm:$0xff] }
  0x57   :  { %722 = vmatprep.subr.bf16.mxu0 %v878_v0 }
  0x58   :  { %721 = vmatpush3.bf16.msra.mxu1 %v720_v51 }
  0x59   :  { %567 = vmatmul.mubr.f32.vlgmr.msra.gmra.mrb[0].mxu0 %v61_v48  ;;  %746 = vmatprep.subr.bf16.mxu1 %v878_v0  ;;  %v768_v48 = vpack.c.bf16 %v363_v47, %v362_v45 }
  0x5a   :  { %636 = vmatprep.mubr.msk.f32.mxu0 %vm879_vm0, %v880_v1  ;;  %724 = vmatpush3.bf16.msra.mxu0 %v723_v55 }
  0x5b   :  { %725 = vmatprep.subr.bf16.mxu0 %v878_v0 }
  0x5e   :  { %727 = vmatpush3.bf16.msra.mxu0 %v726_v57 }
  0x5f   :  { %728 = vmatprep.subr.bf16.mxu0 %v878_v0 }
  0x62   :  { %730 = vmatpush3.bf16.msra.mxu0 %v729_v60 }
  0x63   :  { %731 = vmatprep.subr.bf16.mxu0 %v878_v0 }
  0x66   :  { %733 = vmatpush3.bf16.msra.mxu0 %v732_v63 }
  0x67   :  { %734 = vmatprep.subr.bf16.mxu0 %v878_v0 }
  0x6a   :  { %736 = vmatpush3.bf16.msra.mxu0 %v735_v4 }
  0x6b   :  { %737 = vmatprep.subr.bf16.mxu0 %v878_v0 }
  0x6e   :  { %739 = vmatpush3.bf16.msra.mxu0 %v738_v7 }
  0x6f   :  { %740 = vmatprep.subr.bf16.mxu0 %v878_v0 }
  0x72   :  { %742 = vmatpush3.bf16.msra.mxu0 %v741_v15 }
  0x73   :  { %743 = vmatprep.subr.bf16.mxu0 %v878_v0 }
  0x76   :  { %745 = vmatpush3.bf16.msra.mxu0 %v744_v18 }
 0x12c   :  { %v151_v9 = vpop.f32.mrb[0].mxu0 }
 0x12d   :  { %v152_v10 = vadd.f32 %v460_v8, %v151_v9  ;;  %v568_v11 = vpop.f32.mrb[1].mxu0 }
 0x12f   :  { %v155_v12 = vmax.f32 %v152_v10, 0.0 }
 0x131   :  { %602 = vmatmul.mubr.f32.vlgmr.msra.gmra.mrb[0].mxu1 %v155_v12 }
 0x132   :  { %671 = vmatprep.mubr.msk.f32.mxu1 %vm879_vm0, %v880_v1  ;;  %748 = vmatpush3.bf16.msra.mxu1 %v747_v22  ;;  %v352_v1 = vld [vmem:[#allocation7 + $0xa0] sm:$0xff] }
 0x133   :  { %749 = vmatprep.subr.bf16.mxu1 %v878_v0  ;;  %v753_v26 = vpack.c.bf16 %v353_v25, %v352_v1 }
 0x136   :  { %751 = vmatpush3.bf16.msra.mxu1 %v750_v24 }
 0x137   :  { %752 = vmatprep.subr.bf16.mxu1 %v878_v0 }
 0x13a   :  { %754 = vmatpush3.bf16.msra.mxu1 %v753_v26 }
 0x13b   :  { %755 = vmatprep.subr.bf16.mxu1 %v878_v0 }
 0x13e   :  { %757 = vmatpush3.bf16.msra.mxu1 %v756_v29 }
 0x13f   :  { %758 = vmatprep.subr.bf16.mxu1 %v878_v0 }
 0x142   :  { %760 = vmatpush3.bf16.msra.mxu1 %v759_v32 }
 0x143   :  { %761 = vmatprep.subr.bf16.mxu1 %v878_v0 }
 0x146   :  { %763 = vmatpush3.bf16.msra.mxu1 %v762_v35 }
 0x147   :  { %764 = vmatprep.subr.bf16.mxu1 %v878_v0 }
 0x14a   :  { %766 = vmatpush3.bf16.msra.mxu1 %v765_v38 }
 0x14b   :  { %767 = vmatprep.subr.bf16.mxu1 %v878_v0 }
 0x14e   :  { %769 = vmatpush3.bf16.msra.mxu1 %v768_v48 }
 0x204   :  { %v245_v40 = vpop.f32.mrb[0].mxu1 }
 0x205   :  { %v246_v41 = vadd.f32 %v461_v39, %v245_v40  ;;  %v603_v42 = vpop.f32.mrb[1].mxu1 }
 0x207   :  { %v249_v43 = vadd.f32 %v246_v41, %v971_v46 }
 0x209   :  { %v250_v44 = vmax.f32 %v249_v43, 0.0 }
 0x20b   :  { %637 = vmatmul.mubr.f32.vlgmr.msra.gmra.mrb[2].mxu0 %v250_v44 }
 0x2de   :  { %v342_v0 = vpop.f32.mrb[2].mxu0 }
 0x2df   :  { %v343_v50 = vadd.f32 %v463_v49, %v342_v0  ;;  %v638_v51 = vpop.f32.mrb[3].mxu0 }
 0x2e1   :  { %v346_v52 = vmax.f32 %v343_v50, 0.0 }
 0x2e3   :  { %672 = vmatmul.mubr.f32.vlgmr.msra.gmra.mrb[2].mxu1 %v346_v52 }
 0x3b6   :  { %v438_v46 = vpop.f32.mrb[2].mxu1 }
 0x3b7   :  { %v439_v54 = vadd.f32 %v465_v53, %v438_v46  ;;  %v673_v55 = vpop.f32.mrb[3].mxu1 }
 0x3b9   :  { %v442_v56 = vadd.f32 %v439_v54, %v249_v43 }
 0x3bb   :  { %443 = vst [vmem:[#allocation8] sm:$0xf] %v442_v56 }
 0x3bc   :  { %856 = shalt.err (!%p853_p0)
}
 0x3bd   :  { %s857_s15 = scalar_lea.hbm %s1027_s5, 64 }
 0x3be   :  { %p858_p1 = scmp.ne.s32.totalorder %s1027_s5, %s857_s15  ;;  %p861_p2 = scmp.lt.u32.totalorder %s857_s15, %s1027_s5 }
 0x3c0   :  { %p863_p3 = pnand %p861_p2, %p858_p1 }
 0x3c2   :  { %866 = shalt.err (!%p863_p3)
}
 0x3c3   :  { %453 = dma.vmem_to_hbm [thread:$0]  %s451_s12, 64, %s1027_s5, [#allocation4]  }
 0x3c4   :  { %871 = dma.done.wait [#allocation4], 64  }
 0x3c5   :  { %872 = vsyncadd [#allocation4], 4294967232 }
 0x3c6   :  { %457 = vsyncpa [#allocation3], 1 }
 0x3c7   :  { %458 = vsyncpa [#allocation6], 1 }
 0x3c8   :  { %459 = vsyncpa [#allocation4], 1 }

</bundles_post_ra>
